<compile_context>
chip_gen: v7x
topology: tpu7x:2x2x1
jax: 0.10.0
libtpu: 0.0.40
codegen_flags: <defaults>
</compile_context>

<pallas_src>
import jax
import jax.numpy as jnp
from jax.experimental import pallas as pl
from jax.experimental.pallas import tpu as pltpu


# ---------------------------------------------------------------------------
# Kernels
# ---------------------------------------------------------------------------
def _stats_kernel(x1_ref, x2_ref, w1_ref, w2_ref, sum_ref, sq_ref):
    """Pass 1: ReLU + the two 1x1 convs on the MXU; accumulate global BN sums.

    x1_ref, x2_ref : [TM, C_in]   even/even and odd/odd stride-2 phases
    w1_ref, w2_ref : [C_in, C_half]
    sum_ref, sq_ref: [2, C_half] f32, resident across the inner grid axis
                     (row 0 <-> conv_1 channels, row 1 <-> conv_2 channels).
    """
    @pl.when(pl.program_id(1) == 0)
    def _init():
        sum_ref[...] = jnp.zeros_like(sum_ref)
        sq_ref[...] = jnp.zeros_like(sq_ref)

    x1 = jnp.maximum(x1_ref[...], 0)                    # ReLU (compute dtype)
    x2 = jnp.maximum(x2_ref[...], 0)
    h1 = jnp.dot(x1, w1_ref[...], preferred_element_type=jnp.float32)
    h2 = jnp.dot(x2, w2_ref[...], preferred_element_type=jnp.float32)
    sum_ref[...] += jnp.concatenate(
        [jnp.sum(h1, axis=0, keepdims=True),
         jnp.sum(h2, axis=0, keepdims=True)], axis=0)
    sq_ref[...] += jnp.concatenate(
        [jnp.sum(h1 * h1, axis=0, keepdims=True),
         jnp.sum(h2 * h2, axis=0, keepdims=True)], axis=0)


def _apply_kernel(x1_ref, x2_ref, w1_ref, w2_ref, scale_ref, shift_ref,
                  out_ref):
    """Pass 2: recompute the cheap conv and apply folded BN: h*scale + shift.

    scale_ref/shift_ref: [2, C_half] f32 (row per conv branch).
    out_ref: [TM, C_out]; conv_1 channels in [:, :C_half], conv_2 in the rest.
    """
    ch = w1_ref.shape[1]
    x1 = jnp.maximum(x1_ref[...], 0)
    x2 = jnp.maximum(x2_ref[...], 0)
    h1 = jnp.dot(x1, w1_ref[...], preferred_element_type=jnp.float32)
    h2 = jnp.dot(x2, w2_ref[...], preferred_element_type=jnp.float32)
    y1 = h1 * scale_ref[0:1, :] + shift_ref[0:1, :]
    y2 = h2 * scale_ref[1:2, :] + shift_ref[1:2, :]
    out_ref[:, :ch] = y1.astype(out_ref.dtype)
    out_ref[:, ch:] = y2.astype(out_ref.dtype)


# ---------------------------------------------------------------------------
# Sizing helpers
# ---------------------------------------------------------------------------
def _vmem_budget():
    """Per-generation working-set budget and scoped VMEM limit (bytes)."""
    try:
        cap = int(pltpu.get_tpu_info().vmem_capacity_bytes)
    except Exception:
        cap = 64 * 1024 * 1024          # conservative: v7x has 64 MiB / TC
    budget = min(40 * 1024 * 1024, cap // 2)
    limit = min(max(budget + 16 * 1024 * 1024, 32 * 1024 * 1024),
                cap - 8 * 1024 * 1024)
    return budget, limit


def _pick_row_tile(m, tm_max, aligns=(16, 8)):
    """Largest divisor of m that is <= tm_max and a multiple of an alignment.

    Alignment 16 keeps bf16 input tiles on natural (16,128) sublane packing;
    8 is the Mosaic minimum for the f32 output block's second-minor dim.
    Falls back to m (a full-extent block is always legal) only when no
    aligned divisor exists -- rare for even H, W.
    """
    tm_max = max(1, min(int(tm_max), m))
    for align in aligns:
        best = 0
        d = 1
        while d * d <= m:
            if m % d == 0:
                for t in (d, m // d):
                    if t <= tm_max and t % align == 0 and t > best:
                        best = t
            d += 1
        if best:
            return best
    return m


# ---------------------------------------------------------------------------
# Wrapper
# ---------------------------------------------------------------------------
def factorized_reduce(x_nchw, w1, w2, gamma, beta, *, eps=1e-5,
                      compute_dtype=jnp.bfloat16, out_dtype=None,
                      out_format="NCHW", tile_rows=None):
    """x_nchw: [N, C_in, H, W] (H, W even).  w1/w2: [C_half, C_in, 1, 1]."""
    N, C_in, H, W = x_nchw.shape
    assert H % 2 == 0 and W % 2 == 0, "FactorizedReduce needs even H, W"
    C_half = w1.shape[0]
    assert w2.shape[0] == C_half and w1.shape[1] == C_in
    C_out = 2 * C_half
    Ho, Wo = H // 2, W // 2
    M = N * Ho * Wo
    if out_dtype is None:
        out_dtype = x_nchw.dtype

    # --- Phase gather fused with the layout change + bf16 cast --------------
    # One XLA fusion per phase straight from NCHW: reads x once (strided),
    # writes only the needed quarter per phase in the compute dtype.  ReLU is
    # elementwise, so slicing before it (done here) matches the module.
    x1 = jnp.transpose(x_nchw[:, :, 0::2, 0::2],
                       (0, 2, 3, 1)).reshape(M, C_in).astype(compute_dtype)
    x2 = jnp.transpose(x_nchw[:, :, 1::2, 1::2],
                       (0, 2, 3, 1)).reshape(M, C_in).astype(compute_dtype)

    # 1x1 conv weights as [C_in, C_half] matmul operands (compute dtype).
    w1m = jnp.transpose(w1[:, :, 0, 0], (1, 0)).astype(compute_dtype)
    w2m = jnp.transpose(w2[:, :, 0, 0], (1, 0)).astype(compute_dtype)

    # --- Per-generation VMEM budget -> row tile ------------------------------
    budget, vmem_limit = _vmem_budget()
    cb = jnp.dtype(compute_dtype).itemsize
    ob = jnp.dtype(out_dtype).itemsize
    fixed = 2 * 2 * C_in * C_half * cb            # w1, w2 double-buffered
    fixed += 6 * 2 * C_half * 4                   # stats / scale / shift
    fixed += 1 << 20                              # compiler temporaries slack
    per_row = (2 * 2 * C_in * cb                  # x1, x2 double-buffered
               + 2 * C_out * ob                   # out tile double-buffered
               + C_out * 4 + 2 * C_in * 4)        # live f32 intermediates
    tm_max = max(8, (budget - fixed) // per_row)
    if tile_rows is not None:
        tm_max = min(tm_max, int(tile_rows))
    TM = _pick_row_tile(M, tm_max)
    n_tiles = M // TM if M % TM == 0 else 1
    if M % TM != 0:                               # fallback path: TM == M
        TM = M
        n_tiles = 1

    # --- Pass 1: global per-channel sum / sum-of-squares --------------------
    # Leading "parallel" axis of size NC splits the resident accumulators per
    # TensorCore on v7x; inner "arbitrary" axis carries them.
    NC = 2 if (n_tiles >= 2 and n_tiles % 2 == 0) else 1
    T = n_tiles // NC
    stat_spec = pl.BlockSpec((None, 2, C_half), lambda c, i: (c, 0, 0))
    sum_h, sum_sq = pl.pallas_call(
        _stats_kernel,
        grid=(NC, T),
        in_specs=[
            pl.BlockSpec((TM, C_in), lambda c, i: (c * T + i, 0)),
            pl.BlockSpec((TM, C_in), lambda c, i: (c * T + i, 0)),
            pl.BlockSpec((C_in, C_half), lambda c, i: (0, 0)),
            pl.BlockSpec((C_in, C_half), lambda c, i: (0, 0)),
        ],
        out_specs=[stat_spec, stat_spec],
        out_shape=[jax.ShapeDtypeStruct((NC, 2, C_half), jnp.float32),
                   jax.ShapeDtypeStruct((NC, 2, C_half), jnp.float32)],
        compiler_params=pltpu.CompilerParams(
            dimension_semantics=("parallel", "arbitrary"),
            vmem_limit_bytes=vmem_limit),
    )(x1, x2, w1m, w2m)

    # --- Fold BN into one FMA: out = h*scale + shift (tiny [2, C_half] math) -
    s1 = jnp.sum(sum_h, axis=0)                    # [2, C_half]
    s2 = jnp.sum(sum_sq, axis=0)
    mean = s1 / M
    var = jnp.maximum(s2 / M - mean * mean, 0.0)   # biased batch variance
    gamma2 = gamma.astype(jnp.float32).reshape(2, C_half)
    beta2 = beta.astype(jnp.float32).reshape(2, C_half)
    scale = gamma2 * jax.lax.rsqrt(var + eps)
    shift = beta2 - mean * scale

    # --- Pass 2: recompute conv per tile, normalize, dense un-padded store ---
    out_flat = pl.pallas_call(
        _apply_kernel,
        grid=(n_tiles,),
        in_specs=[
            pl.BlockSpec((TM, C_in), lambda i: (i, 0)),
            pl.BlockSpec((TM, C_in), lambda i: (i, 0)),
            pl.BlockSpec((C_in, C_half), lambda i: (0, 0)),
            pl.BlockSpec((C_in, C_half), lambda i: (0, 0)),
            pl.BlockSpec((2, C_half), lambda i: (0, 0)),
            pl.BlockSpec((2, C_half), lambda i: (0, 0)),
        ],
        out_specs=pl.BlockSpec((TM, C_out), lambda i: (i, 0)),
        out_shape=jax.ShapeDtypeStruct((M, C_out), out_dtype),
        compiler_params=pltpu.CompilerParams(
            dimension_semantics=("parallel",),
            vmem_limit_bytes=vmem_limit),
    )(x1, x2, w1m, w2m, scale, shift)

    out = out_flat.reshape(N, Ho, Wo, C_out)       # free reshape to NHWC
    if out_format == "NHWC":
        return out
    return jnp.transpose(out, (0, 3, 1, 2))        # PyTorch-parity NCHW


# ---------------------------------------------------------------------------
# Pure-JAX reference (mirrors the PyTorch forward, training-mode BN).
# compute_dtype=bf16 reproduces the kernel's only lossy step (bf16 rounding of
# the matmul operands) while keeping accumulation / BN math in f32.
# ---------------------------------------------------------------------------
def reference(x_nchw, w1, w2, gamma, beta, *, compute_dtype=jnp.float32,
              eps=1e-5):
    hp = jax.lax.Precision.HIGHEST
    x = jnp.maximum(x_nchw, 0.0)
    xa = x[:, :, 0::2, 0::2].astype(compute_dtype).astype(jnp.float32)
    xb = x[:, :, 1::2, 1::2].astype(compute_dtype).astype(jnp.float32)
    w1m = w1[:, :, 0, 0].astype(compute_dtype).astype(jnp.float32)
    w2m = w2[:, :, 0, 0].astype(compute_dtype).astype(jnp.float32)
    o1 = jnp.einsum("nchw,oc->nohw", xa, w1m, precision=hp)
    o2 = jnp.einsum("nchw,oc->nohw", xb, w2m, precision=hp)
    o = jnp.concatenate([o1, o2], axis=1)
    mean = jnp.mean(o, axis=(0, 2, 3), keepdims=True)
    var = jnp.mean((o - mean) ** 2, axis=(0, 2, 3), keepdims=True)
    return ((o - mean) * jax.lax.rsqrt(var + eps)
            * gamma.reshape(1, -1, 1, 1) + beta.reshape(1, -1, 1, 1))


if __name__ == "__main__":
    key = jax.random.PRNGKey(0)
    N, C_in, H, W = 2, 4, 16, 16
    C_out = 8
    C_half = C_out // 2

    k_x, k_w1, k_w2 = jax.random.split(key, 3)
    x = jax.random.normal(k_x, (N, C_in, H, W), dtype=jnp.float32)

    # kaiming_normal_ (default: fan_in = C_in*1*1, gain=sqrt(2))
    std = (2.0 / C_in) ** 0.5
    w1 = std * jax.random.normal(k_w1, (C_half, C_in, 1, 1), dtype=jnp.float32)
    w2 = std * jax.random.normal(k_w2, (C_half, C_in, 1, 1), dtype=jnp.float32)
    gamma = jnp.ones((C_out,), dtype=jnp.float32)   # BN weight filled with 1
    beta = jnp.zeros((C_out,), dtype=jnp.float32)   # BN bias zeroed

    # Default perf path: bf16 matmul operands, f32 accumulation / BN math,
    # f32 NCHW output for module parity.
    out = jax.jit(factorized_reduce)(x, w1, w2, gamma, beta)
    jax.block_until_ready(out)
    assert out.shape == (N, C_out, H // 2, W // 2), out.shape

    # (a) Exactness against a reference that mirrors the kernel's bf16-operand
    #     / f32-accumulate recipe: must match tightly.
    ref_matched = reference(x, w1, w2, gamma, beta, compute_dtype=jnp.bfloat16)
    err_m = float(jnp.max(jnp.abs(out - ref_matched)))
    assert jnp.allclose(out, ref_matched, atol=5e-4, rtol=5e-4), err_m

    # (b) Semantic fidelity against the pure-f32 PyTorch forward: only bf16
    #     input/weight rounding separates the two.
    ref_f32 = reference(x, w1, w2, gamma, beta)
    err_f = float(jnp.max(jnp.abs(out - ref_f32)))
    assert jnp.allclose(out, ref_f32, atol=3e-2, rtol=3e-2), err_f

    print("KERNEL_OK")
</pallas_src>

<mosaic_0001>
module attributes {stable_mosaic.version = 11 : i64} {
  func.func @_stats_kernel(%arg0: i32, %arg1: i32, %arg2: memref<128x4xbf16, #tpu.memory_space<vmem>>, %arg3: memref<128x4xbf16, #tpu.memory_space<vmem>>, %arg4: memref<4x4xbf16, #tpu.memory_space<vmem>>, %arg5: memref<4x4xbf16, #tpu.memory_space<vmem>>, %arg6: memref<1x2x4xf32, #tpu.memory_space<vmem>>, %arg7: memref<1x2x4xf32, #tpu.memory_space<vmem>>) attributes {dimension_semantics = [#tpu.dimension_semantics<parallel>, #tpu.dimension_semantics<arbitrary>], iteration_bounds = array<i64: 1, 1>, scalar_prefetch = 0 : i64, scratch_operands = 0 : i64, tpu.core_type = #tpu.core_type<tc>, window_params = [{transform_indices = @transform_0, window_bounds = array<i64: 128, 4>}, {transform_indices = @transform_1, window_bounds = array<i64: 128, 4>}, {pipeline_mode = #tpu.pipeline_mode<synchronous>, transform_indices = @transform_2, window_bounds = array<i64: 4, 4>}, {pipeline_mode = #tpu.pipeline_mode<synchronous>, transform_indices = @transform_3, window_bounds = array<i64: 4, 4>}, {transform_indices = @transform_4, window_bounds = array<i64: 1, 2, 4>}, {transform_indices = @transform_5, window_bounds = array<i64: 1, 2, 4>}]} {
    %c0_i32 = arith.constant 0 : i32
    %0 = arith.cmpi eq, %arg1, %c0_i32 : i32
    %1 = arith.extui %0 : i1 to i32
    %c0_i32_0 = arith.constant 0 : i32
    %2 = arith.cmpi ne, %1, %c0_i32_0 : i32
    scf.if %2 {
      %cst_27 = arith.constant 0.000000e+00 : f32
      %37 = vector.broadcast %cst_27 : f32 to vector<2x4xf32>
      %c0_28 = arith.constant 0 : index
      %c0_29 = arith.constant 0 : index
      %c0_30 = arith.constant 0 : index
      %38 = vector.load %arg6[%c0_28, %c0_29, %c0_30] : memref<1x2x4xf32, #tpu.memory_space<vmem>>, vector<1x2x4xf32>
      %39 = vector.shape_cast %38 : vector<1x2x4xf32> to vector<2x4xf32>
      %40 = vector.shape_cast %37 : vector<2x4xf32> to vector<1x2x4xf32>
      tpu.vector_store %arg6[%c0_28, %c0_29, %c0_30], %40 {strides = array<i32>} : memref<1x2x4xf32, #tpu.memory_space<vmem>>, vector<1x2x4xf32>,
      %cst_31 = arith.constant 0.000000e+00 : f32
      %41 = vector.broadcast %cst_31 : f32 to vector<2x4xf32>
      %c0_32 = arith.constant 0 : index
      %c0_33 = arith.constant 0 : index
      %c0_34 = arith.constant 0 : index
      %42 = vector.load %arg7[%c0_32, %c0_33, %c0_34] : memref<1x2x4xf32, #tpu.memory_space<vmem>>, vector<1x2x4xf32>
      %43 = vector.shape_cast %42 : vector<1x2x4xf32> to vector<2x4xf32>
      %44 = vector.shape_cast %41 : vector<2x4xf32> to vector<1x2x4xf32>
      tpu.vector_store %arg7[%c0_32, %c0_33, %c0_34], %44 {strides = array<i32>} : memref<1x2x4xf32, #tpu.memory_space<vmem>>, vector<1x2x4xf32>,
    } else {
    }
    %c0 = arith.constant 0 : index
    %c0_1 = arith.constant 0 : index
    %3 = vector.load %arg2[%c0, %c0_1] : memref<128x4xbf16, #tpu.memory_space<vmem>>, vector<128x4xbf16>
    %cst = arith.constant 0.000000e+00 : bf16
    %4 = vector.broadcast %cst : bf16 to vector<128x4xbf16>
    %5 = arith.maximumf %3, %4 : vector<128x4xbf16>
    %c0_2 = arith.constant 0 : index
    %c0_3 = arith.constant 0 : index
    %6 = vector.load %arg3[%c0_2, %c0_3] : memref<128x4xbf16, #tpu.memory_space<vmem>>, vector<128x4xbf16>
    %cst_4 = arith.constant 0.000000e+00 : bf16
    %7 = vector.broadcast %cst_4 : bf16 to vector<128x4xbf16>
    %8 = arith.maximumf %6, %7 : vector<128x4xbf16>
    %c0_5 = arith.constant 0 : index
    %c0_6 = arith.constant 0 : index
    %9 = vector.load %arg4[%c0_5, %c0_6] : memref<4x4xbf16, #tpu.memory_space<vmem>>, vector<4x4xbf16>
    %cst_7 = arith.constant dense<0.000000e+00> : vector<128x4xf32>
    %10 = tpu.matmul %5, %9, %cst_7 {dimension_numbers = #tpu.dot_dimension_numbers<[1], [0], [0], [1], [0, 0, 1, 1], [], []>} : vector<128x4xbf16>, vector<4x4xbf16>, vector<128x4xf32> -> vector<128x4xf32>
    %c0_8 = arith.constant 0 : index
    %c0_9 = arith.constant 0 : index
    %11 = vector.load %arg5[%c0_8, %c0_9] : memref<4x4xbf16, #tpu.memory_space<vmem>>, vector<4x4xbf16>
    %cst_10 = arith.constant dense<0.000000e+00> : vector<128x4xf32>
    %12 = tpu.matmul %8, %11, %cst_10 {dimension_numbers = #tpu.dot_dimension_numbers<[1], [0], [0], [1], [0, 0, 1, 1], [], []>} : vector<128x4xbf16>, vector<4x4xbf16>, vector<128x4xf32> -> vector<128x4xf32>
    %c0_11 = arith.constant 0 : index
    %c0_12 = arith.constant 0 : index
    %c0_13 = arith.constant 0 : index
    %13 = vector.load %arg6[%c0_11, %c0_12, %c0_13] : memref<1x2x4xf32, #tpu.memory_space<vmem>>, vector<1x2x4xf32>
    %14 = vector.shape_cast %13 : vector<1x2x4xf32> to vector<2x4xf32>
    %cst_14 = arith.constant dense<0.000000e+00> : vector<4xf32>
    %15 = vector.multi_reduction <add>, %10, %cst_14 [0] : vector<128x4xf32> to vector<4xf32>
    %16 = vector.shape_cast %15 : vector<4xf32> to vector<1x4xf32>
    %cst_15 = arith.constant dense<0.000000e+00> : vector<4xf32>
    %17 = vector.multi_reduction <add>, %12, %cst_15 [0] : vector<128x4xf32> to vector<4xf32>
    %18 = vector.shape_cast %17 : vector<4xf32> to vector<1x4xf32>
    %19 = tpu.concatenate %16, %18 in 0 : vector<1x4xf32>, vector<1x4xf32> -> vector<2x4xf32>
    %20 = arith.addf %14, %19 : vector<2x4xf32>
    %c0_16 = arith.constant 0 : index
    %c0_17 = arith.constant 0 : index
    %c0_18 = arith.constant 0 : index
    %21 = vector.load %arg6[%c0_16, %c0_17, %c0_18] : memref<1x2x4xf32, #tpu.memory_space<vmem>>, vector<1x2x4xf32>
    %22 = vector.shape_cast %21 : vector<1x2x4xf32> to vector<2x4xf32>
    %23 = vector.shape_cast %20 : vector<2x4xf32> to vector<1x2x4xf32>
    tpu.vector_store %arg6[%c0_16, %c0_17, %c0_18], %23 {strides = array<i32>} : memref<1x2x4xf32, #tpu.memory_space<vmem>>, vector<1x2x4xf32>,
    %c0_19 = arith.constant 0 : index
    %c0_20 = arith.constant 0 : index
    %c0_21 = arith.constant 0 : index
    %24 = vector.load %arg7[%c0_19, %c0_20, %c0_21] : memref<1x2x4xf32, #tpu.memory_space<vmem>>, vector<1x2x4xf32>
    %25 = vector.shape_cast %24 : vector<1x2x4xf32> to vector<2x4xf32>
    %26 = arith.mulf %10, %10 : vector<128x4xf32>
    %cst_22 = arith.constant dense<0.000000e+00> : vector<4xf32>
    %27 = vector.multi_reduction <add>, %26, %cst_22 [0] : vector<128x4xf32> to vector<4xf32>
    %28 = vector.shape_cast %27 : vector<4xf32> to vector<1x4xf32>
    %29 = arith.mulf %12, %12 : vector<128x4xf32>
    %cst_23 = arith.constant dense<0.000000e+00> : vector<4xf32>
    %30 = vector.multi_reduction <add>, %29, %cst_23 [0] : vector<128x4xf32> to vector<4xf32>
    %31 = vector.shape_cast %30 : vector<4xf32> to vector<1x4xf32>
    %32 = tpu.concatenate %28, %31 in 0 : vector<1x4xf32>, vector<1x4xf32> -> vector<2x4xf32>
    %33 = arith.addf %25, %32 : vector<2x4xf32>
    %c0_24 = arith.constant 0 : index
    %c0_25 = arith.constant 0 : index
    %c0_26 = arith.constant 0 : index
    %34 = vector.load %arg7[%c0_24, %c0_25, %c0_26] : memref<1x2x4xf32, #tpu.memory_space<vmem>>, vector<1x2x4xf32>
    %35 = vector.shape_cast %34 : vector<1x2x4xf32> to vector<2x4xf32>
    %36 = vector.shape_cast %33 : vector<2x4xf32> to vector<1x2x4xf32>
    tpu.vector_store %arg7[%c0_24, %c0_25, %c0_26], %36 {strides = array<i32>} : memref<1x2x4xf32, #tpu.memory_space<vmem>>, vector<1x2x4xf32>,
    return
  }
  func.func @transform_0(%arg0: i32, %arg1: i32) -> (i32, i32) {
    %c1_i32 = arith.constant 1 : i32
    %0 = arith.muli %arg0, %c1_i32 : i32
    %1 = arith.addi %0, %arg1 : i32
    %c0_i32 = arith.constant 0 : i32
    %c0_i32_0 = arith.constant 0 : i32
    return %1, %c0_i32 : i32, i32
  }
  func.func @transform_1(%arg0: i32, %arg1: i32) -> (i32, i32) {
    %c1_i32 = arith.constant 1 : i32
    %0 = arith.muli %arg0, %c1_i32 : i32
    %1 = arith.addi %0, %arg1 : i32
    %c0_i32 = arith.constant 0 : i32
    %c0_i32_0 = arith.constant 0 : i32
    return %1, %c0_i32 : i32, i32
  }
  func.func @transform_2(%arg0: i32, %arg1: i32) -> (i32, i32) {
    %c0_i32 = arith.constant 0 : i32
    %c0_i32_0 = arith.constant 0 : i32
    %c0_i32_1 = arith.constant 0 : i32
    return %c0_i32, %c0_i32_0 : i32, i32
  }
  func.func @transform_3(%arg0: i32, %arg1: i32) -> (i32, i32) {
    %c0_i32 = arith.constant 0 : i32
    %c0_i32_0 = arith.constant 0 : i32
    %c0_i32_1 = arith.constant 0 : i32
    return %c0_i32, %c0_i32_0 : i32, i32
  }
  func.func @transform_4(%arg0: i32, %arg1: i32) -> (i32, i32, i32) {
    %c0_i32 = arith.constant 0 : i32
    %c0_i32_0 = arith.constant 0 : i32
    %c0_i32_1 = arith.constant 0 : i32
    return %arg0, %c0_i32, %c0_i32_0 : i32, i32, i32
  }
  func.func @transform_5(%arg0: i32, %arg1: i32) -> (i32, i32, i32) {
    %c0_i32 = arith.constant 0 : i32
    %c0_i32_0 = arith.constant 0 : i32
    %c0_i32_1 = arith.constant 0 : i32
    return %arg0, %c0_i32, %c0_i32_0 : i32, i32, i32
  }
}

module attributes {stable_mosaic.version = 11 : i64} {
  func.func @_apply_kernel(%arg0: i32, %arg1: memref<128x4xbf16, #tpu.memory_space<vmem>>, %arg2: memref<128x4xbf16, #tpu.memory_space<vmem>>, %arg3: memref<4x4xbf16, #tpu.memory_space<vmem>>, %arg4: memref<4x4xbf16, #tpu.memory_space<vmem>>, %arg5: memref<2x4xf32, #tpu.memory_space<vmem>>, %arg6: memref<2x4xf32, #tpu.memory_space<vmem>>, %arg7: memref<128x8xf32, #tpu.memory_space<vmem>>) attributes {dimension_semantics = [#tpu.dimension_semantics<parallel>], iteration_bounds = array<i64: 1>, scalar_prefetch = 0 : i64, scratch_operands = 0 : i64, tpu.core_type = #tpu.core_type<tc>, window_params = [{transform_indices = @transform_0, window_bounds = array<i64: 128, 4>}, {transform_indices = @transform_1, window_bounds = array<i64: 128, 4>}, {pipeline_mode = #tpu.pipeline_mode<synchronous>, transform_indices = @transform_2, window_bounds = array<i64: 4, 4>}, {pipeline_mode = #tpu.pipeline_mode<synchronous>, transform_indices = @transform_3, window_bounds = array<i64: 4, 4>}, {pipeline_mode = #tpu.pipeline_mode<synchronous>, transform_indices = @transform_4, window_bounds = array<i64: 2, 4>}, {pipeline_mode = #tpu.pipeline_mode<synchronous>, transform_indices = @transform_5, window_bounds = array<i64: 2, 4>}, {transform_indices = @transform_6, window_bounds = array<i64: 128, 8>}]} {
    %c0 = arith.constant 0 : index
    %c0_0 = arith.constant 0 : index
    %0 = vector.load %arg1[%c0, %c0_0] : memref<128x4xbf16, #tpu.memory_space<vmem>>, vector<128x4xbf16>
    %cst = arith.constant 0.000000e+00 : bf16
    %1 = vector.broadcast %cst : bf16 to vector<128x4xbf16>
    %2 = arith.maximumf %0, %1 : vector<128x4xbf16>
    %c0_1 = arith.constant 0 : index
    %c0_2 = arith.constant 0 : index
    %3 = vector.load %arg2[%c0_1, %c0_2] : memref<128x4xbf16, #tpu.memory_space<vmem>>, vector<128x4xbf16>
    %cst_3 = arith.constant 0.000000e+00 : bf16
    %4 = vector.broadcast %cst_3 : bf16 to vector<128x4xbf16>
    %5 = arith.maximumf %3, %4 : vector<128x4xbf16>
    %c0_4 = arith.constant 0 : index
    %c0_5 = arith.constant 0 : index
    %6 = vector.load %arg3[%c0_4, %c0_5] : memref<4x4xbf16, #tpu.memory_space<vmem>>, vector<4x4xbf16>
    %cst_6 = arith.constant dense<0.000000e+00> : vector<128x4xf32>
    %7 = tpu.matmul %2, %6, %cst_6 {dimension_numbers = #tpu.dot_dimension_numbers<[1], [0], [0], [1], [0, 0, 1, 1], [], []>} : vector<128x4xbf16>, vector<4x4xbf16>, vector<128x4xf32> -> vector<128x4xf32>
    %c0_7 = arith.constant 0 : index
    %c0_8 = arith.constant 0 : index
    %8 = vector.load %arg4[%c0_7, %c0_8] : memref<4x4xbf16, #tpu.memory_space<vmem>>, vector<4x4xbf16>
    %cst_9 = arith.constant dense<0.000000e+00> : vector<128x4xf32>
    %9 = tpu.matmul %5, %8, %cst_9 {dimension_numbers = #tpu.dot_dimension_numbers<[1], [0], [0], [1], [0, 0, 1, 1], [], []>} : vector<128x4xbf16>, vector<4x4xbf16>, vector<128x4xf32> -> vector<128x4xf32>
    %c0_10 = arith.constant 0 : index
    %c0_11 = arith.constant 0 : index
    %10 = vector.load %arg5[%c0_10, %c0_11] : memref<2x4xf32, #tpu.memory_space<vmem>>, vector<1x4xf32>
    %11 = vector.broadcast %10 : vector<1x4xf32> to vector<128x4xf32>
    %12 = arith.mulf %7, %11 : vector<128x4xf32>
    %c0_12 = arith.constant 0 : index
    %c0_13 = arith.constant 0 : index
    %13 = vector.load %arg6[%c0_12, %c0_13] : memref<2x4xf32, #tpu.memory_space<vmem>>, vector<1x4xf32>
    %14 = vector.broadcast %13 : vector<1x4xf32> to vector<128x4xf32>
    %15 = arith.addf %12, %14 : vector<128x4xf32>
    %c1 = arith.constant 1 : index
    %c0_14 = arith.constant 0 : index
    %16 = vector.load %arg5[%c1, %c0_14] : memref<2x4xf32, #tpu.memory_space<vmem>>, vector<1x4xf32>
    %17 = vector.broadcast %16 : vector<1x4xf32> to vector<128x4xf32>
    %18 = arith.mulf %9, %17 : vector<128x4xf32>
    %c1_15 = arith.constant 1 : index
    %c0_16 = arith.constant 0 : index
    %19 = vector.load %arg6[%c1_15, %c0_16] : memref<2x4xf32, #tpu.memory_space<vmem>>, vector<1x4xf32>
    %20 = vector.broadcast %19 : vector<1x4xf32> to vector<128x4xf32>
    %21 = arith.addf %18, %20 : vector<128x4xf32>
    %c0_17 = arith.constant 0 : index
    %c0_18 = arith.constant 0 : index
    %22 = vector.load %arg7[%c0_17, %c0_18] : memref<128x8xf32, #tpu.memory_space<vmem>>, vector<128x4xf32>
    tpu.vector_store %arg7[%c0_17, %c0_18], %15 {strides = array<i32>} : memref<128x8xf32, #tpu.memory_space<vmem>>, vector<128x4xf32>,
    %c0_19 = arith.constant 0 : index
    %c4 = arith.constant 4 : index
    %23 = vector.load %arg7[%c0_19, %c4] : memref<128x8xf32, #tpu.memory_space<vmem>>, vector<128x4xf32>
    tpu.vector_store %arg7[%c0_19, %c4], %21 {strides = array<i32>} : memref<128x8xf32, #tpu.memory_space<vmem>>, vector<128x4xf32>,
    return
  }
  func.func @transform_0(%arg0: i32) -> (i32, i32) {
    %c0_i32 = arith.constant 0 : i32
    %c0_i32_0 = arith.constant 0 : i32
    return %arg0, %c0_i32 : i32, i32
  }
  func.func @transform_1(%arg0: i32) -> (i32, i32) {
    %c0_i32 = arith.constant 0 : i32
    %c0_i32_0 = arith.constant 0 : i32
    return %arg0, %c0_i32 : i32, i32
  }
  func.func @transform_2(%arg0: i32) -> (i32, i32) {
    %c0_i32 = arith.constant 0 : i32
    %c0_i32_0 = arith.constant 0 : i32
    %c0_i32_1 = arith.constant 0 : i32
    return %c0_i32, %c0_i32_0 : i32, i32
  }
  func.func @transform_3(%arg0: i32) -> (i32, i32) {
    %c0_i32 = arith.constant 0 : i32
    %c0_i32_0 = arith.constant 0 : i32
    %c0_i32_1 = arith.constant 0 : i32
    return %c0_i32, %c0_i32_0 : i32, i32
  }
  func.func @transform_4(%arg0: i32) -> (i32, i32) {
    %c0_i32 = arith.constant 0 : i32
    %c0_i32_0 = arith.constant 0 : i32
    %c0_i32_1 = arith.constant 0 : i32
    return %c0_i32, %c0_i32_0 : i32, i32
  }
  func.func @transform_5(%arg0: i32) -> (i32, i32) {
    %c0_i32 = arith.constant 0 : i32
    %c0_i32_0 = arith.constant 0 : i32
    %c0_i32_1 = arith.constant 0 : i32
    return %c0_i32, %c0_i32_0 : i32, i32
  }
  func.func @transform_6(%arg0: i32) -> (i32, i32) {
    %c0_i32 = arith.constant 0 : i32
    %c0_i32_0 = arith.constant 0 : i32
    return %arg0, %c0_i32 : i32, i32
  }
}

</mosaic_0001>

<bundles_post_ra>
// kernel: factorized_reduce.3
= control target key start
LH: loop header
LB: loop body
LE: loop exit
PB: predicated region body
PF: predicated region fallthrough
CT: control target
= control target key end

     0   :  { %vm154_vm0 = vcmask 1041408   ;;  %v699_v4 = vmov 0   ;;  %vm129_vm1 = vcmask 31744   ;;  %s700_s14 = smov 4   ;;  %vm584_vm2 = vcmask 64544   ;;  %s1118_s3 = inlined_call_operand.vmem [shape: bf16[4,4], index: 3, kind: input, shape index: {}]   ;;  %s1119_s1 = inlined_call_operand.vmem [shape: bf16[128,4], index: 1, kind: input, shape index: {}]   ;;  %s1120_s2 = inlined_call_operand.vmem [shape: bf16[4,4], index: 2, kind: input, shape index: {}]   ;;  %s1121_s0 = inlined_call_operand.vmem [shape: bf16[128,4], index: 0, kind: input, shape index: {}]   ;;  %s1122_s4 = inlined_call_operand.vmem [shape: f32[2,4], index: 4, kind: input, shape index: {}]   ;;  %s1123_s5 = inlined_call_operand.vmem [shape: f32[2,4], index: 5, kind: input, shape index: {}]   ;;  %s1124_s6 = inlined_call_operand.vmem [shape: f32[128,8], index: 6, kind: output, shape index: {}]  }
   0x1   :  { %v255_v0 = vld [vmem:[%s1118_s3] sm:$0x3]  ;;  %v57_v2 = vld [vmem:[%s1119_s1 + $0x4] sm:$0xf]  ;;  %v58_v7 = vld [vmem:[%s1119_s1 + $0x8] sm:$0xf] }
   0x2   :  { %v56_v1 = vld [vmem:[%s1119_s1] sm:$0xf]  ;;  %696 = vmatprep.subr.msk.bf16.mxu1 %vm154_vm0, %v255_v0  ;;  %v321_v3 = vsel %vm154_vm0, %v255_v0, 0  ;;  %v73_v6 = vmax.bf16 %v699_v4, %v57_v2  ;;  %v59_v8 = vld [vmem:[%s1119_s1 + $0xc] sm:$0xf]  ;;  %v74_v9 = vmax.bf16 %v699_v4, %v58_v7 }
   0x3   :  { %v72_v5 = vmax.bf16 %v699_v4, %v56_v1  ;;  %678 = vmatpush3.bf16.msra.mxu1 %v321_v3  ;;  %v75_v10 = vmax.bf16 %v699_v4, %v59_v8  ;;  %v60_v11 = vld [vmem:[%s1119_s1 + $0x10] sm:$0xf]  ;;  %v61_v12 = vld [vmem:[%s1119_s1 + $0x14] sm:$0xf]  ;;  %v62_v16 = vld [vmem:[%s1119_s1 + $0x18] sm:$0xf] }
   0x4   :  { %v76_v14 = vmax.bf16 %v699_v4, %v60_v11  ;;  %v77_v15 = vmax.bf16 %v699_v4, %v61_v12  ;;  %v63_v17 = vld [vmem:[%s1119_s1 + $0x1c] sm:$0xf]  ;;  %v64_v19 = vld [vmem:[%s1119_s1 + $0x20] sm:$0xf]  ;;  %v65_v20 = vld [vmem:[%s1119_s1 + $0x24] sm:$0xf]  ;;  %v78_v22 = vmax.bf16 %v699_v4, %v62_v16 }
   0x5   :  { %v621_v13 = vcombine.low %v72_v5, %v73_v6  ;;  %v622_v18 = vcombine.low %v74_v9, %v75_v10  ;;  %v79_v23 = vmax.bf16 %v699_v4, %v63_v17  ;;  %v88_v24 = vld [vmem:[%s1120_s2] sm:$0x3]  ;;  %v25_v26 = vld [vmem:[%s1121_s0 + $0x4] sm:$0xf]  ;;  %v80_v27 = vmax.bf16 %v699_v4, %v64_v19  ;;  %v26_v31 = vld [vmem:[%s1121_s0 + $0x8] sm:$0xf] }
   0x6   :  { %v623_v21 = vcombine.low %v76_v14, %v77_v15  ;;  %v24_v25 = vld [vmem:[%s1121_s0] sm:$0xf]  ;;  %v81_v28 = vmax.bf16 %v699_v4, %v65_v20  ;;  %695 = vmatprep.subr.msk.bf16.mxu0 %vm154_vm0, %v88_v24  ;;  %v156_v29 = vsel %vm154_vm0, %v88_v24, 0  ;;  %v27_v32 = vld [vmem:[%s1121_s0 + $0xc] sm:$0xf]  ;;  %v41_v33 = vmax.bf16 %v699_v4, %v25_v26 }
   0x7   :  { %679 = vmatprep.mubr.msk.bf16.mxu1 %vm129_vm1, %v621_v13  ;;  %v40_v30 = vmax.bf16 %v699_v4, %v24_v25  ;;  %660 = vmatpush3.bf16.msra.mxu0 %v156_v29  ;;  %v42_v34 = vmax.bf16 %v699_v4, %v26_v31  ;;  %v43_v35 = vmax.bf16 %v699_v4, %v27_v32  ;;  %v28_v36 = vld [vmem:[%s1121_s0 + $0x10] sm:$0xf]  ;;  %v29_v37 = vld [vmem:[%s1121_s0 + $0x14] sm:$0xf]  ;;  %v66_v41 = vld [vmem:[%s1119_s1 + $0x28] sm:$0xf] }
   0x8   :  { %680 = vmatmul.mubr.msk.bf16.vlgmr.msra.gmra.mrb[0].mxu1 %vm129_vm1, %v622_v18  ;;  %v44_v38 = vmax.bf16 %v699_v4, %v28_v36  ;;  %v45_v39 = vmax.bf16 %v699_v4, %v29_v37  ;;  %v624_v40 = vcombine.low %v78_v22, %v79_v23  ;;  %v30_v44 = vld [vmem:[%s1121_s0 + $0x18] sm:$0xf]  ;;  %v31_v45 = vld [vmem:[%s1121_s0 + $0x1c] sm:$0xf]  ;;  %v625_v46 = vcombine.low %v80_v27, %v81_v28  ;;  %v67_v47 = vld [vmem:[%s1119_s1 + $0x2c] sm:$0xf] }
   0x9   :  { %683 = vmatprep.mubr.msk.bf16.mxu1 %vm129_vm1, %v623_v21  ;;  %v605_v42 = vcombine.low %v40_v30, %v41_v33  ;;  %v606_v43 = vcombine.low %v42_v34, %v43_v35  ;;  %v32_v49 = vld [vmem:[%s1121_s0 + $0x20] sm:$0xf]  ;;  %v33_v50 = vld [vmem:[%s1121_s0 + $0x24] sm:$0xf]  ;;  %v68_v51 = vld [vmem:[%s1119_s1 + $0x30] sm:$0xf]  ;;  %v82_v53 = vmax.bf16 %v699_v4, %v66_v41  ;;  %v46_v54 = vmax.bf16 %v699_v4, %v30_v44 }
   0xa   :  { %v607_v48 = vcombine.low %v44_v38, %v45_v39  ;;  %v69_v52 = vld [vmem:[%s1119_s1 + $0x34] sm:$0xf]  ;;  %v47_v55 = vmax.bf16 %v699_v4, %v31_v45  ;;  %v83_v56 = vmax.bf16 %v699_v4, %v67_v47  ;;  %v48_v57 = vmax.bf16 %v699_v4, %v32_v49  ;;  %v70_v63 = vld [vmem:[%s1119_s1 + $0x38] sm:$0xf]  ;;  %v34_v1 = vld [vmem:[%s1121_s0 + $0x28] sm:$0xf] }
   0xb   :  { %661 = vmatprep.mubr.msk.bf16.mxu0 %vm129_vm1, %v605_v42  ;;  %v49_v58 = vmax.bf16 %v699_v4, %v33_v50  ;;  %v84_v59 = vmax.bf16 %v699_v4, %v68_v51  ;;  %v85_v60 = vmax.bf16 %v699_v4, %v69_v52  ;;  %v35_v2 = vld [vmem:[%s1121_s0 + $0x2c] sm:$0xf]  ;;  %v71_v5 = vld [vmem:[%s1119_s1 + $0x3c] sm:$0xf]  ;;  %v36_v6 = vld [vmem:[%s1121_s0 + $0x30] sm:$0xf]  ;;  %v86_v8 = vmax.bf16 %v699_v4, %v70_v63 }
   0xc   :  { %662 = vmatmul.mubr.msk.bf16.vlgmr.msra.gmra.mrb[0].mxu0 %vm129_vm1, %v606_v43  ;;  %v608_v61 = vcombine.low %v46_v54, %v47_v55  ;;  %v626_v62 = vcombine.low %v82_v53, %v83_v56  ;;  %v37_v7 = vld [vmem:[%s1121_s0 + $0x34] sm:$0xf]  ;;  %v50_v9 = vmax.bf16 %v699_v4, %v34_v1  ;;  %v51_v10 = vmax.bf16 %v699_v4, %v35_v2  ;;  %v38_v17 = vld [vmem:[%s1121_s0 + $0x38] sm:$0xf]  ;;  %v39_v18 = vld [vmem:[%s1121_s0 + $0x3c] sm:$0xf] }
   0xd   :  { %665 = vmatprep.mubr.msk.bf16.mxu0 %vm129_vm1, %v607_v48  ;;  %v609_v0 = vcombine.low %v48_v57, %v49_v58  ;;  %v627_v3 = vcombine.low %v84_v59, %v85_v60  ;;  %v87_v11 = vmax.bf16 %v699_v4, %v71_v5  ;;  %v52_v12 = vmax.bf16 %v699_v4, %v36_v6  ;;  %v893_v22 = vld [vmem:[%s1122_s4 + $0x1] ss:$0 sm:$0xff]  ;;  %v910_v33 = vld [vmem:[%s1122_s4] ss:$0 sm:$0xff] }
   0xe   :  { %v53_v13 = vmax.bf16 %v699_v4, %v37_v7  ;;  %v610_v14 = vcombine.low %v50_v9, %v51_v10  ;;  %v54_v19 = vmax.bf16 %v699_v4, %v38_v17  ;;  %v55_v20 = vmax.bf16 %v699_v4, %v39_v18  ;;  %v898_v24 = vld [vmem:[%s1123_s5 + $0x1] ss:$0 sm:$0xff]  ;;  %v917_v36 = vld [vmem:[%s1123_s5] ss:$0 sm:$0xff] }
   0xf   :  { %v628_v15 = vcombine.low %v86_v8, %v87_v11 }
  0x10   :  { %684 = vmatmul.mubr.msk.bf16.gmra.mrb[4].mxu1 %vm129_vm1, %v624_v40  ;;  %v611_v16 = vcombine.low %v52_v12, %v53_v13  ;;  %v612_v21 = vcombine.low %v54_v19, %v55_v20 }
  0x11   :  { %687 = vmatprep.mubr.msk.bf16.mxu1 %vm129_vm1, %v625_v46 }
  0x14   :  { %666 = vmatmul.mubr.msk.bf16.gmra.mrb[4].mxu0 %vm129_vm1, %v608_v61 }
  0x15   :  { %669 = vmatprep.mubr.msk.bf16.mxu0 %vm129_vm1, %v609_v0 }
  0x18   :  { %688 = vmatmul.mubr.msk.bf16.gmra.mrb[8].mxu1 %vm129_vm1, %v626_v62 }
  0x19   :  { %691 = vmatprep.mubr.msk.bf16.mxu1 %vm129_vm1, %v627_v3 }
  0x1c   :  { %670 = vmatmul.mubr.msk.bf16.gmra.mrb[8].mxu0 %vm129_vm1, %v610_v14 }
  0x1d   :  { %673 = vmatprep.mubr.msk.bf16.mxu0 %vm129_vm1, %v611_v16 }
  0x20   :  { %692 = vmatmul.mubr.msk.bf16.gmra.mrb[12].mxu1 %vm129_vm1, %v628_v15 }
  0x24   :  { %674 = vmatmul.mubr.msk.bf16.gmra.mrb[12].mxu0 %vm129_vm1, %v612_v21 }
  0xdb   :  { %v681_v23 = vpop.f32.mrb[0].mxu1 }
  0xdc   :  { %v469_v4 = vmul.f32 %v681_v23, %v893_v22  ;;  %v357_v25 = vpop.f32.mrb[1].mxu1 }
  0xdd   :  { %v467_v26 = vmul.f32 %v893_v22, %v357_v25  ;;  %v682_v27 = vpop.f32.mrb[2].mxu1 }
  0xde   :  { %v470_v28 = vmul.f32 %v682_v27, %v893_v22  ;;  %v360_v29 = vpop.f32.mrb[3].mxu1  ;;  %v490_v30 = vadd.f32 %v898_v24, %v469_v4 }
  0xdf   :  { %v468_v31 = vmul.f32 %v893_v22, %v360_v29  ;;  %v488_v32 = vadd.f32 %v898_v24, %v467_v26  ;;  %v663_v35 = vpop.f32.mrb[0].mxu0 }
  0xe0   :  { %540 = vrot.lane.b32.xlu1 %v490_v30, %s700_s14  ;;  %v491_v34 = vadd.f32 %v898_v24, %v470_v28  ;;  %v427_v39 = vmul.f32 %v663_v35, %v910_v33  ;;  %v192_v40 = vpop.f32.mrb[1].mxu0 }
  0xe1   :  { %536 = vrot.lane.b32.xlu0 %v488_v32, %s700_s14  ;;  %v489_v37 = vadd.f32 %v898_v24, %v468_v31  ;;  %v425_v43 = vmul.f32 %v910_v33, %v192_v40  ;;  %v664_v44 = vpop.f32.mrb[2].mxu0 }
  0xe2   :  { %v448_v46 = vadd.f32 %v917_v36, %v427_v39  ;;  %v428_v47 = vmul.f32 %v664_v44, %v910_v33  ;;  %v195_v48 = vpop.f32.mrb[3].mxu0 }
  0xe3   :  { %v685_v38 = vpop.f32.mrb[4].mxu1  ;;  %v446_v52 = vadd.f32 %v917_v36, %v425_v43  ;;  %v426_v53 = vmul.f32 %v910_v33, %v195_v48 }
  0xe4   :  { %v473_v41 = vmul.f32 %v685_v38, %v893_v22  ;;  %542 = vrot.lane.b32.xlu1 %v491_v34, %s700_s14  ;;  %v373_v42 = vpop.f32.mrb[5].mxu1  ;;  %506 = vst.msk [vmem:[%s1124_s6 + $0x10] sm:$0xff] %vm129_vm1, %v448_v46  ;;  %v449_v55 = vadd.f32 %v917_v36, %v428_v47 }
  0xe5   :  { %538 = vrot.lane.b32.xlu0 %v489_v37, %s700_s14  ;;  %v686_v45 = vpop.f32.mrb[6].mxu1  ;;  %v471_v54 = vmul.f32 %v893_v22, %v373_v42  ;;  %504 = vst.msk [vmem:[%s1124_s6] sm:$0xff] %vm129_vm1, %v446_v52  ;;  %v447_v58 = vadd.f32 %v917_v36, %v426_v53 }
  0xe6   :  { %v494_v49 = vadd.f32 %v898_v24, %v473_v41  ;;  %v474_v50 = vmul.f32 %v686_v45, %v893_v22  ;;  %v376_v51 = vpop.f32.mrb[7].mxu1  ;;  %507 = vst.msk [vmem:[%s1124_s6 + $0x18] sm:$0xff] %vm129_vm1, %v449_v55 }
  0xe7   :  { %v472_v57 = vmul.f32 %v893_v22, %v376_v51  ;;  %505 = vst.msk [vmem:[%s1124_s6 + $0x8] sm:$0xff] %vm129_vm1, %v447_v58  ;;  %v667_v59 = vpop.f32.mrb[4].mxu0  ;;  %v492_v60 = vadd.f32 %v898_v24, %v471_v54 }
  0xe8   :  { %v495_v56 = vadd.f32 %v898_v24, %v474_v50  ;;  %v431_v62 = vmul.f32 %v667_v59, %v910_v33  ;;  %v208_v63 = vpop.f32.mrb[5].mxu0 }
  0xe9   :  { %548 = vrot.lane.b32.xlu0 %v494_v49, %s700_s14  ;;  %v493_v0 = vadd.f32 %v898_v24, %v472_v57  ;;  %v429_v3 = vmul.f32 %v910_v33, %v208_v63  ;;  %v668_v5 = vpop.f32.mrb[6].mxu0 }
  0xea   :  { %550 = vrot.lane.b32.xlu1 %v495_v56, %s700_s14  ;;  %v452_v7 = vadd.f32 %v917_v36, %v431_v62  ;;  %v432_v8 = vmul.f32 %v668_v5, %v910_v33  ;;  %v211_v9 = vpop.f32.mrb[7].mxu0 }
  0xeb   :  { %v689_v61 = vpop.f32.mrb[8].mxu1  ;;  %v450_v13 = vadd.f32 %v917_v36, %v429_v3  ;;  %v430_v14 = vmul.f32 %v910_v33, %v211_v9 }
  0xec   :  { %v477_v1 = vmul.f32 %v689_v61, %v893_v22  ;;  %v389_v2 = vpop.f32.mrb[9].mxu1  ;;  %510 = vst.msk [vmem:[%s1124_s6 + $0x30] sm:$0xff] %vm129_vm1, %v452_v7  ;;  %v453_v16 = vadd.f32 %v917_v36, %v432_v8 }
  0xed   :  { %544 = vrot.lane.b32.xlu0 %v492_v60, %s700_s14  ;;  %v690_v6 = vpop.f32.mrb[10].mxu1  ;;  %v475_v15 = vmul.f32 %v893_v22, %v389_v2  ;;  %508 = vst.msk [vmem:[%s1124_s6 + $0x20] sm:$0xff] %vm129_vm1, %v450_v13  ;;  %v451_v19 = vadd.f32 %v917_v36, %v430_v14 }
  0xee   :  { %v498_v10 = vadd.f32 %v898_v24, %v477_v1  ;;  %v478_v11 = vmul.f32 %v690_v6, %v893_v22  ;;  %546 = vrot.lane.b32.xlu1 %v493_v0, %s700_s14  ;;  %v392_v12 = vpop.f32.mrb[11].mxu1  ;;  %511 = vst.msk [vmem:[%s1124_s6 + $0x38] sm:$0xff] %vm129_vm1, %v453_v16 }
  0xef   :  { %v476_v18 = vmul.f32 %v893_v22, %v392_v12  ;;  %509 = vst.msk [vmem:[%s1124_s6 + $0x28] sm:$0xff] %vm129_vm1, %v451_v19  ;;  %v671_v20 = vpop.f32.mrb[8].mxu0  ;;  %v496_v21 = vadd.f32 %v898_v24, %v475_v15 }
  0xf0   :  { %v499_v17 = vadd.f32 %v898_v24, %v478_v11  ;;  %v435_v4 = vmul.f32 %v671_v20, %v910_v33  ;;  %v224_v25 = vpop.f32.mrb[9].mxu0 }
  0xf1   :  { %556 = vrot.lane.b32.xlu0 %v498_v10, %s700_s14  ;;  %v497_v26 = vadd.f32 %v898_v24, %v476_v18  ;;  %v433_v28 = vmul.f32 %v910_v33, %v224_v25  ;;  %v672_v29 = vpop.f32.mrb[10].mxu0 }
  0xf2   :  { %558 = vrot.lane.b32.xlu1 %v499_v17, %s700_s14  ;;  %v456_v32 = vadd.f32 %v917_v36, %v435_v4  ;;  %v436_v34 = vmul.f32 %v672_v29, %v910_v33  ;;  %v227_v35 = vpop.f32.mrb[11].mxu0 }
  0xf3   :  { %v693_v23 = vpop.f32.mrb[12].mxu1  ;;  %v454_v38 = vadd.f32 %v917_v36, %v433_v28  ;;  %v434_v39 = vmul.f32 %v910_v33, %v227_v35 }
  0xf4   :  { %v405_v27 = vpop.f32.mrb[13].mxu1  ;;  %v481_v40 = vmul.f32 %v693_v23, %v893_v22  ;;  %514 = vst.msk [vmem:[%s1124_s6 + $0x50] sm:$0xff] %vm129_vm1, %v456_v32  ;;  %v457_v43 = vadd.f32 %v917_v36, %v436_v34 }
  0xf5   :  { %v479_v30 = vmul.f32 %v893_v22, %v405_v27  ;;  %552 = vrot.lane.b32.xlu0 %v496_v21, %s700_s14  ;;  %v694_v31 = vpop.f32.mrb[14].mxu1  ;;  %512 = vst.msk [vmem:[%s1124_s6 + $0x40] sm:$0xff] %vm129_vm1, %v454_v38  ;;  %v455_v44 = vadd.f32 %v917_v36, %v434_v39 }
  0xf6   :  { %554 = vrot.lane.b32.xlu1 %v497_v26, %s700_s14  ;;  %v408_v37 = vpop.f32.mrb[15].mxu1  ;;  %v482_v45 = vmul.f32 %v694_v31, %v893_v22  ;;  %515 = vst.msk [vmem:[%s1124_s6 + $0x58] sm:$0xff] %vm129_vm1, %v457_v43  ;;  %v502_v48 = vadd.f32 %v898_v24, %v481_v40 }
  0xf7   :  { %v500_v41 = vadd.f32 %v898_v24, %v479_v30  ;;  %v480_v42 = vmul.f32 %v893_v22, %v408_v37  ;;  %513 = vst.msk [vmem:[%s1124_s6 + $0x48] sm:$0xff] %vm129_vm1, %v455_v44  ;;  %v675_v47 = vpop.f32.mrb[12].mxu0 }
  0xf8   :  { %v439_v22 = vmul.f32 %v675_v47, %v910_v33  ;;  %v240_v49 = vpop.f32.mrb[13].mxu0  ;;  %v503_v52 = vadd.f32 %v898_v24, %v482_v45 }
  0xf9   :  { %v501_v46 = vadd.f32 %v898_v24, %v480_v42  ;;  %560 = vrot.lane.b32.xlu0 %v500_v41, %s700_s14  ;;  %v437_v50 = vmul.f32 %v910_v33, %v240_v49  ;;  %v676_v51 = vpop.f32.mrb[14].mxu0 }
  0xfa   :  { %v460_v53 = vadd.f32 %v917_v36, %v439_v22  ;;  %v440_v54 = vmul.f32 %v676_v51, %v910_v33  ;;  %v243_v55 = vpop.f32.mrb[15].mxu0 }
  0xfb   :  { %562 = vrot.lane.b32.xlu1 %v501_v46, %s700_s14  ;;  %v458_v56 = vadd.f32 %v917_v36, %v437_v50  ;;  %v438_v57 = vmul.f32 %v910_v33, %v243_v55 }
  0xfc   :  { %518 = vst.msk [vmem:[%s1124_s6 + $0x70] sm:$0xff] %vm129_vm1, %v460_v53  ;;  %v461_v24 = vadd.f32 %v917_v36, %v440_v54 }
  0xfd   :  { %564 = vrot.lane.b32.xlu0 %v502_v48, %s700_s14  ;;  %516 = vst.msk [vmem:[%s1124_s6 + $0x60] sm:$0xff] %vm129_vm1, %v458_v56  ;;  %v459_v58 = vadd.f32 %v917_v36, %v438_v57 }
  0xfe   :  { %519 = vst.msk [vmem:[%s1124_s6 + $0x78] sm:$0xff] %vm129_vm1, %v461_v24 }
  0xff   :  { %566 = vrot.lane.b32.xlu1 %v503_v52, %s700_s14  ;;  %517 = vst.msk [vmem:[%s1124_s6 + $0x68] sm:$0xff] %vm129_vm1, %v459_v58 }
 0x152   :  { %v541_v33 = vpop.permute.xlu1 %540 }
 0x153   :  { %587 = vst.msk [vmem:[%s1124_s6 + $0x10] sm:$0xff] %vm584_vm2, %v541_v33  ;;  %v537_v59 = vpop.permute.xlu0 %536 }
 0x154   :  { %585 = vst.msk [vmem:[%s1124_s6] sm:$0xff] %vm584_vm2, %v537_v59 }
 0x156   :  { %v543_v36 = vpop.permute.xlu1 %542 }
 0x157   :  { %588 = vst.msk [vmem:[%s1124_s6 + $0x18] sm:$0xff] %vm584_vm2, %v543_v36  ;;  %v539_v60 = vpop.permute.xlu0 %538 }
 0x158   :  { %586 = vst.msk [vmem:[%s1124_s6 + $0x8] sm:$0xff] %vm584_vm2, %v539_v60 }
 0x15b   :  { %v549_v61 = vpop.permute.xlu0 %548 }
 0x15c   :  { %591 = vst.msk [vmem:[%s1124_s6 + $0x30] sm:$0xff] %vm584_vm2, %v549_v61  ;;  %v551_v62 = vpop.permute.xlu1 %550 }
 0x15d   :  { %592 = vst.msk [vmem:[%s1124_s6 + $0x38] sm:$0xff] %vm584_vm2, %v551_v62 }
 0x15f   :  { %v545_v63 = vpop.permute.xlu0 %544 }
 0x160   :  { %589 = vst.msk [vmem:[%s1124_s6 + $0x20] sm:$0xff] %vm584_vm2, %v545_v63  ;;  %v547_v0 = vpop.permute.xlu1 %546 }
 0x161   :  { %590 = vst.msk [vmem:[%s1124_s6 + $0x28] sm:$0xff] %vm584_vm2, %v547_v0 }
 0x163   :  { %v557_v1 = vpop.permute.xlu0 %556 }
 0x164   :  { %595 = vst.msk [vmem:[%s1124_s6 + $0x50] sm:$0xff] %vm584_vm2, %v557_v1  ;;  %v559_v2 = vpop.permute.xlu1 %558 }
 0x165   :  { %596 = vst.msk [vmem:[%s1124_s6 + $0x58] sm:$0xff] %vm584_vm2, %v559_v2 }
 0x167   :  { %v553_v3 = vpop.permute.xlu0 %552 }
 0x168   :  { %593 = vst.msk [vmem:[%s1124_s6 + $0x40] sm:$0xff] %vm584_vm2, %v553_v3  ;;  %v555_v5 = vpop.permute.xlu1 %554 }
 0x169   :  { %594 = vst.msk [vmem:[%s1124_s6 + $0x48] sm:$0xff] %vm584_vm2, %v555_v5 }
 0x16b   :  { %v561_v6 = vpop.permute.xlu0 %560 }
 0x16c   :  { %597 = vst.msk [vmem:[%s1124_s6 + $0x60] sm:$0xff] %vm584_vm2, %v561_v6 }
 0x16d   :  { %v563_v7 = vpop.permute.xlu1 %562 }
 0x16e   :  { %598 = vst.msk [vmem:[%s1124_s6 + $0x68] sm:$0xff] %vm584_vm2, %v563_v7 }
 0x16f   :  { %v565_v8 = vpop.permute.xlu0 %564 }
 0x170   :  { %599 = vst.msk [vmem:[%s1124_s6 + $0x70] sm:$0xff] %vm584_vm2, %v565_v8 }
 0x171   :  { %v567_v9 = vpop.permute.xlu1 %566 }
 0x172   :  { %600 = vst.msk [vmem:[%s1124_s6 + $0x78] sm:$0xff] %vm584_vm2, %v567_v9 }

// kernel: factorized_reduce.2
= control target key start
LH: loop header
LB: loop body
LE: loop exit
PB: predicated region body
PF: predicated region fallthrough
CT: control target
= control target key end

     0   :  { %vm201_vm0 = vcmask 1041408   ;;  %vm176_vm1 = vcmask 31744   ;;  %v767_v6 = vmov 0   ;;  %vm68_vm2 = vcmask 25600   ;;  %s1035_s2 = inlined_call_operand.vmem [shape: bf16[4,4], index: 2, kind: input, shape index: {}]   ;;  %s1036_s3 = inlined_call_operand.vmem [shape: bf16[4,4], index: 3, kind: input, shape index: {}]   ;;  %s1037_s0 = inlined_call_operand.vmem [shape: bf16[128,4], index: 0, kind: input, shape index: {}]   ;;  %s1038_s1 = inlined_call_operand.vmem [shape: bf16[128,4], index: 1, kind: input, shape index: {}]   ;;  %s1039_s4 = inlined_call_operand.vmem [shape: f32[1,2,4], index: 4, kind: output, shape index: {0}]   ;;  %s1040_s5 = inlined_call_operand.vmem [shape: f32[1,2,4], index: 5, kind: output, shape index: {1}]  }
   0x1   :  { %v135_v0 = vld [vmem:[%s1035_s2] sm:$0x3]  ;;  %v72_v5 = vld [vmem:[%s1037_s0 + $0x4] sm:$0xf]  ;;  %v73_v12 = vld [vmem:[%s1037_s0 + $0x8] sm:$0xf] }
   0x2   :  { %v302_v1 = vld [vmem:[%s1036_s3] sm:$0x3]  ;;  %763 = vmatprep.subr.msk.bf16.mxu0 %vm201_vm0, %v135_v0  ;;  %v203_v3 = vsel %vm201_vm0, %v135_v0, 0  ;;  %v88_v9 = vmax.bf16 %v767_v6, %v72_v5  ;;  %v104_v10 = vld [vmem:[%s1038_s1 + $0x4] sm:$0xf]  ;;  %v89_v15 = vmax.bf16 %v767_v6, %v73_v12  ;;  %vm542_vm3 = vcmask 1040384  }
   0x3   :  { %v71_v2 = vld [vmem:[%s1037_s0] sm:$0xf]  ;;  %764 = vmatprep.subr.msk.bf16.mxu1 %vm201_vm0, %v302_v1  ;;  %v368_v4 = vsel %vm201_vm0, %v302_v1, 0  ;;  %728 = vmatpush3.bf16.msra.mxu0 %v203_v3  ;;  %v74_v13 = vld [vmem:[%s1037_s0 + $0xc] sm:$0xf]  ;;  %v120_v14 = vmax.bf16 %v767_v6, %v104_v10 }
   0x4   :  { %v87_v7 = vmax.bf16 %v767_v6, %v71_v2  ;;  %v103_v8 = vld [vmem:[%s1038_s1] sm:$0xf]  ;;  %746 = vmatpush3.bf16.msra.mxu1 %v368_v4  ;;  %v90_v16 = vmax.bf16 %v767_v6, %v74_v13  ;;  %v105_v17 = vld [vmem:[%s1038_s1 + $0x8] sm:$0xf]  ;;  %v106_v18 = vld [vmem:[%s1038_s1 + $0xc] sm:$0xf] }
   0x5   :  { %v119_v11 = vmax.bf16 %v767_v6, %v103_v8  ;;  %v75_v19 = vld [vmem:[%s1037_s0 + $0x10] sm:$0xf]  ;;  %v121_v21 = vmax.bf16 %v767_v6, %v105_v17  ;;  %v122_v22 = vmax.bf16 %v767_v6, %v106_v18  ;;  %v76_v23 = vld [vmem:[%s1037_s0 + $0x14] sm:$0xf]  ;;  %v77_v31 = vld [vmem:[%s1037_s0 + $0x18] sm:$0xf] }
   0x6   :  { %v677_v20 = vcombine.low %v87_v7, %v88_v9  ;;  %v91_v24 = vmax.bf16 %v767_v6, %v75_v19  ;;  %v107_v25 = vld [vmem:[%s1038_s1 + $0x10] sm:$0xf]  ;;  %v108_v26 = vld [vmem:[%s1038_s1 + $0x14] sm:$0xf]  ;;  %v678_v28 = vcombine.low %v89_v15, %v90_v16  ;;  %v92_v29 = vmax.bf16 %v767_v6, %v76_v23  ;;  %v78_v32 = vld [vmem:[%s1037_s0 + $0x1c] sm:$0xf] }
   0x7   :  { %v693_v27 = vcombine.low %v119_v11, %v120_v14  ;;  %v123_v30 = vmax.bf16 %v767_v6, %v107_v25  ;;  %v109_v33 = vld [vmem:[%s1038_s1 + $0x18] sm:$0xf]  ;;  %v694_v34 = vcombine.low %v121_v21, %v122_v22  ;;  %v124_v35 = vmax.bf16 %v767_v6, %v108_v26  ;;  %v110_v37 = vld [vmem:[%s1038_s1 + $0x1c] sm:$0xf]  ;;  %v79_v38 = vld [vmem:[%s1037_s0 + $0x20] sm:$0xf] }
   0x8   :  { %729 = vmatprep.mubr.msk.bf16.mxu0 %vm176_vm1, %v677_v20  ;;  %v93_v36 = vmax.bf16 %v767_v6, %v77_v31  ;;  %v80_v39 = vld [vmem:[%s1037_s0 + $0x24] sm:$0xf]  ;;  %v679_v40 = vcombine.low %v91_v24, %v92_v29  ;;  %v94_v41 = vmax.bf16 %v767_v6, %v78_v32  ;;  %v125_v42 = vmax.bf16 %v767_v6, %v109_v33  ;;  %v111_v43 = vld [vmem:[%s1038_s1 + $0x20] sm:$0xf]  ;;  %v81_v54 = vld [vmem:[%s1037_s0 + $0x28] sm:$0xf] }
   0x9   :  { %747 = vmatprep.mubr.msk.bf16.mxu1 %vm176_vm1, %v693_v27  ;;  %730 = vmatmul.mubr.msk.bf16.vlgmr.msra.gmra.mrb[0].mxu0 %vm176_vm1, %v678_v28  ;;  %v112_v44 = vld [vmem:[%s1038_s1 + $0x24] sm:$0xf]  ;;  %v695_v45 = vcombine.low %v123_v30, %v124_v35  ;;  %v126_v46 = vmax.bf16 %v767_v6, %v110_v37  ;;  %v95_v47 = vmax.bf16 %v767_v6, %v79_v38  ;;  %v82_v55 = vld [vmem:[%s1037_s0 + $0x2c] sm:$0xf]  ;;  %v113_v56 = vld [vmem:[%s1038_s1 + $0x28] sm:$0xf] }
   0xa   :  { %748 = vmatmul.mubr.msk.bf16.vlgmr.msra.gmra.mrb[0].mxu1 %vm176_vm1, %v694_v34  ;;  %v96_v48 = vmax.bf16 %v767_v6, %v80_v39  ;;  %733 = vmatprep.mubr.msk.bf16.mxu0 %vm176_vm1, %v679_v40  ;;  %v127_v49 = vmax.bf16 %v767_v6, %v111_v43  ;;  %v128_v50 = vmax.bf16 %v767_v6, %v112_v44  ;;  %v114_v58 = vld [vmem:[%s1038_s1 + $0x2c] sm:$0xf]  ;;  %v83_v59 = vld [vmem:[%s1037_s0 + $0x30] sm:$0xf]  ;;  %v84_v60 = vld [vmem:[%s1037_s0 + $0x34] sm:$0xf] }
   0xb   :  { %751 = vmatprep.mubr.msk.bf16.mxu1 %vm176_vm1, %v695_v45  ;;  %v680_v51 = vcombine.low %v93_v36, %v94_v41  ;;  %v696_v52 = vcombine.low %v125_v42, %v126_v46  ;;  %v115_v61 = vld [vmem:[%s1038_s1 + $0x30] sm:$0xf]  ;;  %v116_v62 = vld [vmem:[%s1038_s1 + $0x34] sm:$0xf]  ;;  %v97_v63 = vmax.bf16 %v767_v6, %v81_v54  ;;  %v98_v0 = vmax.bf16 %v767_v6, %v82_v55  ;;  %v85_v11 = vld [vmem:[%s1037_s0 + $0x38] sm:$0xf] }
   0xc   :  { %v681_v53 = vcombine.low %v95_v47, %v96_v48  ;;  %v697_v57 = vcombine.low %v127_v49, %v128_v50  ;;  %v129_v1 = vmax.bf16 %v767_v6, %v113_v56  ;;  %v130_v2 = vmax.bf16 %v767_v6, %v114_v58  ;;  %v86_v12 = vld [vmem:[%s1037_s0 + $0x3c] sm:$0xf]  ;;  %v117_v14 = vld [vmem:[%s1038_s1 + $0x38] sm:$0xf] }
   0xd   :  { %v99_v3 = vmax.bf16 %v767_v6, %v83_v59  ;;  %v100_v4 = vmax.bf16 %v767_v6, %v84_v60  ;;  %v131_v5 = vmax.bf16 %v767_v6, %v115_v61  ;;  %v132_v7 = vmax.bf16 %v767_v6, %v116_v62  ;;  %v118_v15 = vld [vmem:[%s1038_s1 + $0x3c] sm:$0xf] }
   0xe   :  { %v682_v8 = vcombine.low %v97_v63, %v98_v0  ;;  %v698_v9 = vcombine.low %v129_v1, %v130_v2  ;;  %v101_v16 = vmax.bf16 %v767_v6, %v85_v11  ;;  %v102_v17 = vmax.bf16 %v767_v6, %v86_v12 }
   0xf   :  { %v683_v10 = vcombine.low %v99_v3, %v100_v4  ;;  %v699_v13 = vcombine.low %v131_v5, %v132_v7  ;;  %v133_v18 = vmax.bf16 %v767_v6, %v117_v14  ;;  %v134_v19 = vmax.bf16 %v767_v6, %v118_v15 }
  0x10   :  { %v684_v20 = vcombine.low %v101_v16, %v102_v17  ;;  %v768_v22 = vmov 0.0  }
  0x11   :  { %734 = vmatmul.mubr.msk.bf16.gmra.mrb[4].mxu0 %vm176_vm1, %v680_v51  ;;  %v700_v21 = vcombine.low %v133_v18, %v134_v19  ;;  %69 = vst.msk [vmem:[%s1039_s4] sm:$0x3] %vm68_vm2, %v768_v22  ;;  %70 = vst.msk [vmem:[%s1040_s5] sm:$0x3] %vm68_vm2, %v768_v22 }
  0x12   :  { %752 = vmatmul.mubr.msk.bf16.gmra.mrb[4].mxu1 %vm176_vm1, %v696_v52  ;;  %737 = vmatprep.mubr.msk.bf16.mxu0 %vm176_vm1, %v681_v53 }
  0x13   :  { %755 = vmatprep.mubr.msk.bf16.mxu1 %vm176_vm1, %v697_v57 }
  0x19   :  { %738 = vmatmul.mubr.msk.bf16.gmra.mrb[8].mxu0 %vm176_vm1, %v682_v8 }
  0x1a   :  { %756 = vmatmul.mubr.msk.bf16.gmra.mrb[8].mxu1 %vm176_vm1, %v698_v9  ;;  %741 = vmatprep.mubr.msk.bf16.mxu0 %vm176_vm1, %v683_v10 }
  0x1b   :  { %759 = vmatprep.mubr.msk.bf16.mxu1 %vm176_vm1, %v699_v13 }
  0x21   :  { %742 = vmatmul.mubr.msk.bf16.gmra.mrb[12].mxu0 %vm176_vm1, %v684_v20 }
  0x22   :  { %760 = vmatmul.mubr.msk.bf16.gmra.mrb[12].mxu1 %vm176_vm1, %v700_v21 }
  0xdc   :  { %v731_v6 = vpop.f32.mrb[0].mxu0 }
  0xdd   :  { %v550_v23 = vmul.f32 %v731_v6, %v731_v6  ;;  %v749_v24 = vpop.f32.mrb[0].mxu1  ;;  %v239_v25 = vpop.f32.mrb[1].mxu0  ;;  %v471_v28 = vsel %vm176_vm1, %v731_v6, 0.0 }
  0xde   :  { %v404_v26 = vpop.f32.mrb[1].mxu1  ;;  %v732_v27 = vpop.f32.mrb[2].mxu0  ;;  %v548_v29 = vmul.f32 %v239_v25, %v239_v25  ;;  %v508_v32 = vsel %vm176_vm1, %v749_v24, 0.0  ;;  %v603_v33 = vmul.f32 %v749_v24, %v749_v24  ;;  %v468_v34 = vsel %vm176_vm1, %v239_v25, 0.0 }
  0xdf   :  { %v750_v30 = vpop.f32.mrb[2].mxu1  ;;  %v242_v31 = vpop.f32.mrb[3].mxu0  ;;  %v601_v35 = vmul.f32 %v404_v26, %v404_v26  ;;  %v567_v37 = vsel %vm176_vm1, %v550_v23, 0.0  ;;  %v505_v38 = vsel %vm176_vm1, %v404_v26, 0.0  ;;  %v551_v41 = vmul.f32 %v732_v27, %v732_v27 }
  0xe0   :  { %v407_v36 = vpop.f32.mrb[3].mxu1  ;;  %v469_v39 = vsel %vm176_vm1, %v242_v31, 0.0  ;;  %v549_v40 = vmul.f32 %v242_v31, %v242_v31  ;;  %v564_v45 = vsel %vm176_vm1, %v548_v29, 0.0  ;;  %v604_v46 = vmul.f32 %v750_v30, %v750_v30 }
  0xe1   :  { %v470_v42 = vadd.f32 %v469_v39, %v468_v34  ;;  %v506_v43 = vsel %vm176_vm1, %v407_v36, 0.0  ;;  %v602_v44 = vmul.f32 %v407_v36, %v407_v36  ;;  %v617_v49 = vsel %vm176_vm1, %v601_v35, 0.0 }
  0xe2   :  { %v565_v47 = vsel %vm176_vm1, %v549_v40, 0.0  ;;  %v507_v48 = vadd.f32 %v506_v43, %v505_v38  ;;  %v620_v54 = vsel %vm176_vm1, %v603_v33, 0.0  ;;  %v473_v55 = vsel %vm176_vm1, %v732_v27, 0.0 }
  0xe3   :  { %v472_v50 = vadd.f32 %v471_v28, %v470_v42  ;;  %v566_v51 = vadd.f32 %v565_v47, %v564_v45  ;;  %v618_v52 = vsel %vm176_vm1, %v602_v44, 0.0  ;;  %v569_v60 = vsel %vm176_vm1, %v551_v41, 0.0 }
  0xe4   :  { %v735_v53 = vpop.f32.mrb[4].mxu0  ;;  %v509_v56 = vadd.f32 %v508_v32, %v507_v48  ;;  %v619_v57 = vadd.f32 %v618_v52, %v617_v49  ;;  %v510_v61 = vsel %vm176_vm1, %v750_v30, 0.0  ;;  %v622_v2 = vsel %vm176_vm1, %v604_v46, 0.0 }
  0xe5   :  { %v753_v58 = vpop.f32.mrb[4].mxu1  ;;  %v255_v59 = vpop.f32.mrb[5].mxu0  ;;  %v568_v62 = vadd.f32 %v567_v37, %v566_v51  ;;  %v474_v63 = vadd.f32 %v473_v55, %v472_v50  ;;  %v554_v9 = vmul.f32 %v735_v53, %v735_v53  ;;  %v479_v21 = vsel %vm176_vm1, %v735_v53, 0.0 }
  0xe6   :  { %v420_v0 = vpop.f32.mrb[5].mxu1  ;;  %v736_v1 = vpop.f32.mrb[6].mxu0  ;;  %v621_v3 = vadd.f32 %v620_v54, %v619_v57  ;;  %v475_v4 = vsel %vm176_vm1, %v255_v59, 0.0  ;;  %v552_v5 = vmul.f32 %v255_v59, %v255_v59  ;;  %v511_v12 = vadd.f32 %v510_v61, %v509_v56 }
  0xe7   :  { %v754_v7 = vpop.f32.mrb[6].mxu1  ;;  %v258_v8 = vpop.f32.mrb[7].mxu0  ;;  %v476_v10 = vadd.f32 %v475_v4, %v474_v63  ;;  %v570_v11 = vadd.f32 %v569_v60, %v568_v62  ;;  %v512_v15 = vsel %vm176_vm1, %v420_v0, 0.0  ;;  %v605_v16 = vmul.f32 %v420_v0, %v420_v0 }
  0xe8   :  { %v423_v13 = vpop.f32.mrb[7].mxu1  ;;  %v571_v14 = vsel %vm176_vm1, %v552_v5, 0.0  ;;  %v623_v17 = vadd.f32 %v622_v2, %v621_v3  ;;  %v607_v18 = vmul.f32 %v753_v58, %v753_v58  ;;  %v513_v20 = vadd.f32 %v512_v15, %v511_v12 }
  0xe9   :  { %v572_v19 = vadd.f32 %v571_v14, %v570_v11  ;;  %v516_v22 = vsel %vm176_vm1, %v753_v58, 0.0  ;;  %v624_v6 = vsel %vm176_vm1, %v605_v16, 0.0  ;;  %v477_v23 = vsel %vm176_vm1, %v258_v8, 0.0 }
  0xea   :  { %v625_v24 = vadd.f32 %v624_v6, %v623_v17  ;;  %v555_v25 = vmul.f32 %v736_v1, %v736_v1  ;;  %v478_v26 = vadd.f32 %v477_v23, %v476_v10  ;;  %v553_v27 = vmul.f32 %v258_v8, %v258_v8 }
  0xeb   :  { %v575_v29 = vsel %vm176_vm1, %v554_v9, 0.0  ;;  %v608_v30 = vmul.f32 %v754_v7, %v754_v7  ;;  %v514_v31 = vsel %vm176_vm1, %v423_v13, 0.0  ;;  %v606_v32 = vmul.f32 %v423_v13, %v423_v13 }
  0xec   :  { %v739_v28 = vpop.f32.mrb[8].mxu0  ;;  %v628_v35 = vsel %vm176_vm1, %v607_v18, 0.0  ;;  %v480_v36 = vadd.f32 %v479_v21, %v478_v26  ;;  %v573_v37 = vsel %vm176_vm1, %v553_v27, 0.0  ;;  %v515_v38 = vadd.f32 %v514_v31, %v513_v20 }
  0xed   :  { %v757_v33 = vpop.f32.mrb[8].mxu1  ;;  %v271_v34 = vpop.f32.mrb[9].mxu0  ;;  %v481_v41 = vsel %vm176_vm1, %v736_v1, 0.0  ;;  %v518_v42 = vsel %vm176_vm1, %v754_v7, 0.0  ;;  %v574_v43 = vadd.f32 %v573_v37, %v572_v19  ;;  %v626_v44 = vsel %vm176_vm1, %v606_v32, 0.0 }
  0xee   :  { %v436_v39 = vpop.f32.mrb[9].mxu1  ;;  %v740_v40 = vpop.f32.mrb[10].mxu0  ;;  %v577_v47 = vsel %vm176_vm1, %v555_v25, 0.0  ;;  %v517_v48 = vadd.f32 %v516_v22, %v515_v38  ;;  %v627_v49 = vadd.f32 %v626_v44, %v625_v24  ;;  %v482_v50 = vadd.f32 %v481_v41, %v480_v36 }
  0xef   :  { %v758_v45 = vpop.f32.mrb[10].mxu1  ;;  %v274_v46 = vpop.f32.mrb[11].mxu0  ;;  %v630_v52 = vsel %vm176_vm1, %v608_v30, 0.0  ;;  %v576_v53 = vadd.f32 %v575_v29, %v574_v43  ;;  %v483_v54 = vsel %vm176_vm1, %v271_v34, 0.0  ;;  %v556_v55 = vmul.f32 %v271_v34, %v271_v34 }
  0xf0   :  { %v439_v51 = vpop.f32.mrb[11].mxu1  ;;  %v629_v56 = vadd.f32 %v628_v35, %v627_v49  ;;  %v484_v57 = vadd.f32 %v483_v54, %v482_v50  ;;  %v519_v58 = vadd.f32 %v518_v42, %v517_v48  ;;  %v520_v59 = vsel %vm176_vm1, %v436_v39, 0.0 }
  0xf1   :  { %v558_v60 = vmul.f32 %v739_v28, %v739_v28  ;;  %v578_v61 = vadd.f32 %v577_v47, %v576_v53  ;;  %v579_v62 = vsel %vm176_vm1, %v556_v55, 0.0  ;;  %v609_v63 = vmul.f32 %v436_v39, %v436_v39 }
  0xf2   :  { %v611_v0 = vmul.f32 %v757_v33, %v757_v33  ;;  %v521_v1 = vadd.f32 %v520_v59, %v519_v58  ;;  %v631_v2 = vadd.f32 %v630_v52, %v629_v56  ;;  %v487_v4 = vsel %vm176_vm1, %v739_v28, 0.0 }
  0xf3   :  { %v580_v5 = vadd.f32 %v579_v62, %v578_v61  ;;  %v632_v7 = vsel %vm176_vm1, %v609_v63, 0.0  ;;  %v485_v8 = vsel %vm176_vm1, %v274_v46, 0.0  ;;  %v524_v11 = vsel %vm176_vm1, %v757_v33, 0.0 }
  0xf4   :  { %v743_v3 = vpop.f32.mrb[12].mxu0  ;;  %v633_v12 = vadd.f32 %v632_v7, %v631_v2  ;;  %v486_v13 = vadd.f32 %v485_v8, %v484_v57  ;;  %v557_v14 = vmul.f32 %v274_v46, %v274_v46  ;;  %v583_v17 = vsel %vm176_vm1, %v558_v60, 0.0 }
  0xf5   :  { %v761_v9 = vpop.f32.mrb[12].mxu1  ;;  %v287_v10 = vpop.f32.mrb[13].mxu0  ;;  %v559_v18 = vmul.f32 %v740_v40, %v740_v40  ;;  %v522_v19 = vsel %vm176_vm1, %v439_v51, 0.0  ;;  %v610_v20 = vmul.f32 %v439_v51, %v439_v51  ;;  %v636_v6 = vsel %vm176_vm1, %v611_v0, 0.0 }
  0xf6   :  { %v452_v15 = vpop.f32.mrb[13].mxu1  ;;  %v744_v16 = vpop.f32.mrb[14].mxu0  ;;  %v488_v23 = vadd.f32 %v487_v4, %v486_v13  ;;  %v581_v24 = vsel %vm176_vm1, %v557_v14, 0.0  ;;  %v523_v25 = vadd.f32 %v522_v19, %v521_v1  ;;  %v489_v27 = vsel %vm176_vm1, %v740_v40, 0.0 }
  0xf7   :  { %v762_v21 = vpop.f32.mrb[14].mxu1  ;;  %v290_v22 = vpop.f32.mrb[15].mxu0  ;;  %v612_v28 = vmul.f32 %v758_v45, %v758_v45  ;;  %v582_v29 = vadd.f32 %v581_v24, %v580_v5  ;;  %v634_v30 = vsel %vm176_vm1, %v610_v20, 0.0  ;;  %v526_v31 = vsel %vm176_vm1, %v758_v45, 0.0 }
  0xf8   :  { %v455_v26 = vpop.f32.mrb[15].mxu1  ;;  %v525_v32 = vadd.f32 %v524_v11, %v523_v25  ;;  %v635_v33 = vadd.f32 %v634_v30, %v633_v12  ;;  %v490_v34 = vadd.f32 %v489_v27, %v488_v23  ;;  %v585_v35 = vsel %vm176_vm1, %v559_v18, 0.0 }
  0xf9   :  { %v584_v36 = vadd.f32 %v583_v17, %v582_v29  ;;  %v491_v37 = vsel %vm176_vm1, %v287_v10, 0.0  ;;  %v560_v38 = vmul.f32 %v287_v10, %v287_v10  ;;  %v528_v40 = vsel %vm176_vm1, %v452_v15, 0.0 }
  0xfa   :  { %v637_v39 = vadd.f32 %v636_v6, %v635_v33  ;;  %v492_v41 = vadd.f32 %v491_v37, %v490_v34  ;;  %v527_v42 = vadd.f32 %v526_v31, %v525_v32  ;;  %v638_v43 = vsel %vm176_vm1, %v612_v28, 0.0 }
  0xfb   :  { %v586_v44 = vadd.f32 %v585_v35, %v584_v36  ;;  %v587_v46 = vsel %vm176_vm1, %v560_v38, 0.0  ;;  %v613_v45 = vmul.f32 %v452_v15, %v452_v15  ;;  %v495_v49 = vsel %vm176_vm1, %v743_v3, 0.0  ;;  %v467_v38 = vld [vmem:[%s1039_s4] sm:$0x3] }
  0xfc   :  { %v529_v47 = vadd.f32 %v528_v40, %v527_v42  ;;  %v639_v48 = vadd.f32 %v638_v43, %v637_v39  ;;  %v493_v52 = vsel %vm176_vm1, %v290_v22, 0.0  ;;  %v562_v53 = vmul.f32 %v743_v3, %v743_v3  ;;  %v547_v43 = vld [vmem:[%s1040_s5] sm:$0x3] }
  0xfd   :  { %v588_v50 = vadd.f32 %v587_v46, %v586_v44  ;;  %v640_v51 = vsel %vm176_vm1, %v613_v45, 0.0  ;;  %v494_v55 = vadd.f32 %v493_v52, %v492_v41  ;;  %v561_v56 = vmul.f32 %v290_v22, %v290_v22 }
  0xfe   :  { %v641_v54 = vadd.f32 %v640_v51, %v639_v48  ;;  %v532_v57 = vsel %vm176_vm1, %v761_v9, 0.0  ;;  %v615_v58 = vmul.f32 %v761_v9, %v761_v9  ;;  %v530_v59 = vsel %vm176_vm1, %v455_v26, 0.0 }
  0xff   :  { %v614_v60 = vmul.f32 %v455_v26, %v455_v26  ;;  %v563_v61 = vmul.f32 %v744_v16, %v744_v16  ;;  %v496_v62 = vadd.f32 %v495_v49, %v494_v55  ;;  %v589_v63 = vsel %vm176_vm1, %v561_v56, 0.0 }
 0x100   :  { %v531_v0 = vadd.f32 %v530_v59, %v529_v47  ;;  %v497_v1 = vsel %vm176_vm1, %v744_v16, 0.0  ;;  %v616_v2 = vmul.f32 %v762_v21, %v762_v21  ;;  %v590_v4 = vadd.f32 %v589_v63, %v588_v50 }
 0x101   :  { %v642_v3 = vsel %vm176_vm1, %v614_v60, 0.0  ;;  %v591_v5 = vsel %vm176_vm1, %v562_v53, 0.0  ;;  %v498_v7 = vadd.f32 %v497_v1, %v496_v62  ;;  %v644_v9 = vsel %vm176_vm1, %v615_v58, 0.0 }
 0x102   :  { %v533_v8 = vadd.f32 %v532_v57, %v531_v0  ;;  %v643_v10 = vadd.f32 %v642_v3, %v641_v54  ;;  %v534_v11 = vsel %vm176_vm1, %v762_v21, 0.0  ;;  %v592_v12 = vadd.f32 %v591_v5, %v590_v4 }
 0x103   :  { %v593_v13 = vsel %vm176_vm1, %v563_v61, 0.0  ;;  %v499_v14 = vrot.slane %v498_v7, 4  ;;  %v646_v16 = vsel %vm176_vm1, %v616_v2, 0.0 }
 0x104   :  { %v535_v15 = vadd.f32 %v534_v11, %v533_v8  ;;  %v645_v17 = vadd.f32 %v644_v9, %v643_v10  ;;  %v594_v18 = vadd.f32 %v593_v13, %v592_v12 }
 0x105   :  { %v500_v19 = vadd.f32 %v499_v14, %v498_v7 }
 0x106   :  { %v536_v20 = vrot.slane %v535_v15, 4  ;;  %v647_v22 = vadd.f32 %v646_v16, %v645_v17  ;;  %v595_v6 = vrot.slane %v594_v18, 4 }
 0x107   :  { %v501_v23 = vrot.slane %v500_v19, 2 }
 0x108   :  { %v537_v24 = vadd.f32 %v536_v20, %v535_v15  ;;  %v648_v25 = vrot.slane %v647_v22, 4  ;;  %v596_v26 = vadd.f32 %v595_v6, %v594_v18 }
 0x109   :  { %v502_v27 = vadd.f32 %v501_v23, %v500_v19 }
 0x10a   :  { %v538_v28 = vrot.slane %v537_v24, 2  ;;  %v649_v21 = vadd.f32 %v648_v25, %v647_v22  ;;  %v597_v29 = vrot.slane %v596_v26, 2 }
 0x10b   :  { %v503_v30 = vrot.slane %v502_v27, 1 }
 0x10c   :  { %v539_v31 = vadd.f32 %v538_v28, %v537_v24  ;;  %v650_v32 = vrot.slane %v649_v21, 2  ;;  %v598_v33 = vadd.f32 %v597_v29, %v596_v26 }
 0x10d   :  { %v504_v34 = vadd.f32 %v503_v30, %v502_v27 }
 0x10e   :  { %v540_v35 = vrot.slane %v539_v31, 1  ;;  %v651_v36 = vadd.f32 %v650_v32, %v649_v21  ;;  %v599_v37 = vrot.slane %v598_v33, 1 }
 0x110   :  { %v541_v39 = vadd.f32 %v540_v35, %v539_v31  ;;  %v652_v41 = vrot.slane %v651_v36, 1  ;;  %v600_v42 = vadd.f32 %v599_v37, %v598_v33 }
 0x112   :  { %v543_v40 = vsel %vm542_vm3, %v504_v34, %v541_v39  ;;  %v653_v44 = vadd.f32 %v652_v41, %v651_v36 }
 0x113   :  { %v544_v46 = vadd.f32 %v543_v40, %v467_v38 }
 0x114   :  { %v654_v45 = vsel %vm542_vm3, %v600_v42, %v653_v44 }
 0x115   :  { %546 = vst.msk [vmem:[%s1039_s4] sm:$0x3] %vm68_vm2, %v544_v46  ;;  %v655_v47 = vadd.f32 %v654_v45, %v547_v43 }
 0x117   :  { %656 = vst.msk [vmem:[%s1040_s5] sm:$0x3] %vm68_vm2, %v655_v47 }

</bundles_post_ra>
